<compile_context>
chip_gen: v7x
topology: tpu7x:2x2x1
jax: 0.10.0
libtpu: 0.0.40
codegen_flags: <defaults>
</compile_context>

<pallas_src>
import functools
import math

import jax
import jax.numpy as jnp
from jax.experimental import pallas as pl
from jax.experimental.pallas import tpu as pltpu

_EPS = 1e-3                        # fixed self.eps of the PyTorch module
_COS_EPS = math.cos(_EPS)          # cos(eps);  cos(pi - eps) == -cos(eps)
_SIN_EPS = math.sin(_EPS)


def _adaface_kernel(cos_ref, side_ref, out_ref, *, s, n_valid):
    # cos_ref  : VMEM (C, T)       cosine^T tile (caller dtype, e.g. bf16/f32)
    # side_ref : VMEM (4, T) f32   [cos(g_ang), sin(g_ang), g_add, label]
    # out_ref  : VMEM (8, 128) f32 per-tile partial CE sum at [0, 0]
    x = cos_ref[...].astype(jnp.float32)
    x = jnp.clip(x, -1.0 + _EPS, 1.0 - _EPS)                        # (C, T)
    c, t = x.shape

    side = side_ref[...]                                            # (4, T)
    cos_d = side[0:1, :]                                            # cos(g_angular)
    sin_d = side[1:2, :]                                            # sin(g_angular)
    g_add = side[2:3, :]
    lbl = side[3:4, :].astype(jnp.int32)                            # (1, T)

    onehot = jax.lax.broadcasted_iota(jnp.int32, (c, t), 0) == lbl  # (C, T) bool

    # Gather the target-class cosine into one lane-dense (1, T) row.  All the
    # margin math below runs on this row only — non-target classes keep x
    # unchanged because cos(clip(arccos(x), eps, pi-eps)) == x for clamped x.
    x_t = jnp.sum(jnp.where(onehot, x, 0.0), axis=0, keepdims=True)  # (1, T)

    # cos(theta + g_ang) via angle addition (sin(theta) = sqrt(1-x^2) >= 0).
    sin_t = jnp.sqrt(jnp.maximum(1.0 - x_t * x_t, 0.0))
    cos_tm = x_t * cos_d - sin_t * sin_d

    # Reproduce clip(theta + g_ang, eps, pi - eps) without arccos; thresholds
    # are reconstructed in-kernel from cos_d/sin_d by angle addition:
    #   theta + g_ang < eps      <=>  x_t > cos(eps - g_ang)   (only possible if g_ang < eps)
    #   theta + g_ang > pi - eps <=>  x_t < -cos(eps + g_ang)  (only possible if g_ang > -eps)
    low_thr = jnp.where(sin_d < _SIN_EPS,
                        _COS_EPS * cos_d + _SIN_EPS * sin_d, 2.0)
    high_thr = jnp.where(sin_d > -_SIN_EPS,
                         _SIN_EPS * sin_d - _COS_EPS * cos_d, -2.0)
    cos_tm = jnp.where(x_t > low_thr, _COS_EPS, cos_tm)
    cos_tm = jnp.where(x_t < high_thr, -_COS_EPS, cos_tm)

    target_logit = (cos_tm - g_add) * s                             # (1, T)
    logits = jnp.where(onehot, target_logit, x * s)                 # (C, T)

    # Per-column cross entropy: logsumexp over classes minus the target logit
    # (the "picked" value is exactly target_logit).
    mx = jnp.max(logits, axis=0, keepdims=True)
    lse = jnp.log(jnp.sum(jnp.exp(logits - mx), axis=0, keepdims=True)) + mx

    # Validity mask from the *global* column index vs. the true batch size, so
    # padded tail columns never depend on padded data.
    col = jax.lax.broadcasted_iota(jnp.int32, (1, t), 1) + pl.program_id(0) * t
    valid = (col < n_valid).astype(jnp.float32)

    partial = jnp.sum((lse - target_logit) * valid)                 # scalar

    # Lane-dense (8, 128) per-tile output block: partial sum at [0, 0], zeros
    # elsewhere (full-vreg unmasked store; the wrapper sums all blocks).
    row_i = jax.lax.broadcasted_iota(jnp.int32, (8, 128), 0)
    lane_i = jax.lax.broadcasted_iota(jnp.int32, (8, 128), 1)
    out_ref[...] = jnp.where((row_i == 0) & (lane_i == 0), partial, 0.0)


def adaface_loss(cosine, norms, label, *, m=0.4, h=0.333, s=10.0,
                 t_alpha=1.0, prev_batch_mean=20.0, prev_batch_std=100.0,
                 tile_n=8192, cosine_t=None):
    """Forward pass of the PyTorch AdaFace module (returns the scalar loss).

    If the producer can emit the transposed (C, N) cosine directly (classifier
    computed as W(C,D) @ feat^T), pass it via `cosine_t=` to skip the
    wrapper-side transpose copy.  bf16 cosine is passed through untouched.
    """
    if cosine_t is None:
        # TODO(synk): produce the (C, N) layout upstream to avoid this extra
        # HBM pass of the dominant tensor (XLA emits a single fused copy here).
        cosine_t = cosine.T
    c, n = cosine_t.shape
    assert tile_n % 128 == 0 and tile_n > 0

    # ---- tiny O(N) per-row prep in plain JAX (norm stats + margin terms) ----
    safe_norms = jnp.clip(norms.astype(jnp.float32).reshape(-1), 0.001, 100.0)
    mean = jnp.mean(safe_norms)
    std = jnp.std(safe_norms, ddof=1)                 # torch .std() is unbiased
    # register_buffer EMA update (with default t_alpha=1.0 this is just mean/std).
    batch_mean = mean * t_alpha + (1.0 - t_alpha) * prev_batch_mean
    batch_std = std * t_alpha + (1.0 - t_alpha) * prev_batch_std
    margin_scaler = (safe_norms - batch_mean) / (batch_std + _EPS)
    margin_scaler = jnp.clip(margin_scaler * h, -1.0, 1.0)

    g_ang = -m * margin_scaler                        # added to theta at target
    g_add = m + m * margin_scaler                     # subtracted from cos at target
    side = jnp.stack([jnp.cos(g_ang), jnp.sin(g_ang), g_add,
                      label.astype(jnp.float32).reshape(-1)], axis=0)  # (4, N)

    # ---- batch (lane) tiling: balance the tile so padding stays at most one
    #      extra 128-lane group per block, even for large tile_n ----
    n128 = ((n + 127) // 128) * 128
    num_blocks = max(1, -(-n128 // tile_n))           # ceil div
    tile = ((-(-n128 // num_blocks) + 127) // 128) * 128
    n_pad = num_blocks * tile
    pad = n_pad - n
    if pad:
        cosine_t = jnp.pad(cosine_t, ((0, 0), (0, pad)))
        side = jnp.pad(side, ((0, 0), (0, pad)))

    kernel = functools.partial(_adaface_kernel, s=float(s), n_valid=int(n))
    partials = pl.pallas_call(
        kernel,
        out_shape=jax.ShapeDtypeStruct((8, num_blocks * 128), jnp.float32),
        grid=(num_blocks,),
        in_specs=[
            pl.BlockSpec((c, tile), lambda i: (0, i)),   # cosine^T tile
            pl.BlockSpec((4, tile), lambda i: (0, i)),   # margin params + label
        ],
        out_specs=pl.BlockSpec((8, 128), lambda i: (0, i)),
        compiler_params=pltpu.CompilerParams(
            dimension_semantics=("parallel",),           # v7x: both TensorCores
            vmem_limit_bytes=32 * 1024 * 1024),
    )(cosine_t, side)
    # TODO(synk): the module's stateful batch_mean/batch_std buffers are
    # computed functionally above but not persisted (forward returns only loss).
    return jnp.sum(partials) / n


def _reference_adaface(cosine, norms, label, *, m=0.4, h=0.333, s=10.0,
                       t_alpha=1.0, prev_batch_mean=20.0, prev_batch_std=100.0):
    # Pure-JAX mirror of the PyTorch forward (uses arccos/cos directly).
    eps = _EPS
    cosf = jnp.clip(cosine.astype(jnp.float32), -1.0 + eps, 1.0 - eps)
    safe_norms = jnp.clip(norms.astype(jnp.float32), 0.001, 100.0)       # (N, 1)
    mean = jnp.mean(safe_norms)
    std = jnp.std(safe_norms, ddof=1)
    batch_mean = mean * t_alpha + (1.0 - t_alpha) * prev_batch_mean
    batch_std = std * t_alpha + (1.0 - t_alpha) * prev_batch_std
    ms = jnp.clip((safe_norms - batch_mean) / (batch_std + eps) * h, -1.0, 1.0)
    oh = jax.nn.one_hot(label, cosine.shape[1], dtype=jnp.float32)
    m_arc = oh * (-m * ms)
    theta = jnp.arccos(cosf)
    theta_m = jnp.clip(theta + m_arc, eps, jnp.pi - eps)
    cosm = jnp.cos(theta_m) - oh * (m + m * ms)
    scaled = cosm * s
    logp = jax.nn.log_softmax(scaled, axis=-1)
    return -jnp.mean(jnp.sum(oh * logp, axis=-1))


if __name__ == "__main__":
    key = jax.random.PRNGKey(0)
    k1, k2, k3 = jax.random.split(key, 3)

    N, C = 300, 10                      # exercises padding/tail masking
    m_val, h_val, s_val, t_alpha = 0.4, 0.333, 10.0, 1.0

    cosine = jax.random.uniform(k1, (N, C), minval=-1.2, maxval=1.2,
                                dtype=jnp.float32)
    norms = jax.random.uniform(k2, (N, 1), minval=0.5, maxval=60.0,
                               dtype=jnp.float32)
    label = jax.random.randint(k3, (N,), 0, C, dtype=jnp.int32)

    ref = _reference_adaface(cosine, norms, label, m=m_val, h=h_val, s=s_val,
                             t_alpha=t_alpha)

    # Default (large) tile: single grid block with masked tail.
    loss = adaface_loss(cosine, norms, label, m=m_val, h=h_val, s=s_val,
                        t_alpha=t_alpha)
    jax.block_until_ready(loss)
    assert jnp.allclose(loss, ref, atol=1e-4, rtol=1e-4), (loss, ref)

    # Small tile: multiple parallel grid blocks + per-tile partial reduction.
    loss_small = adaface_loss(cosine, norms, label, m=m_val, h=h_val, s=s_val,
                              t_alpha=t_alpha, tile_n=128)
    jax.block_until_ready(loss_small)
    assert jnp.allclose(loss_small, ref, atol=1e-4, rtol=1e-4), (loss_small, ref)

    print("KERNEL_OK")
</pallas_src>

<mosaic_0001>
module attributes {stable_mosaic.version = 11 : i64} {
  func.func @_adaface_kernel(%arg0: i32, %arg1: memref<10x384xf32, #tpu.memory_space<vmem>>, %arg2: memref<4x384xf32, #tpu.memory_space<vmem>>, %arg3: memref<8x128xf32, #tpu.memory_space<vmem>>) attributes {dimension_semantics = [#tpu.dimension_semantics<parallel>], iteration_bounds = array<i64: 1>, scalar_prefetch = 0 : i64, scratch_operands = 0 : i64, tpu.core_type = #tpu.core_type<tc>, window_params = [{transform_indices = @transform_0, window_bounds = array<i64: 10, 384>}, {transform_indices = @transform_1, window_bounds = array<i64: 4, 384>}, {transform_indices = @transform_2, window_bounds = array<i64: 8, 128>}]} {
    %c0 = arith.constant 0 : index
    %c0_0 = arith.constant 0 : index
    %0 = vector.load %arg1[%c0, %c0_0] : memref<10x384xf32, #tpu.memory_space<vmem>>, vector<10x384xf32>
    %cst = arith.constant -9.990000e-01 : f32
    %cst_1 = arith.constant 9.990000e-01 : f32
    %1 = vector.broadcast %cst : f32 to vector<10x384xf32>
    %2 = arith.maximumf %1, %0 : vector<10x384xf32>
    %3 = vector.broadcast %cst_1 : f32 to vector<10x384xf32>
    %4 = arith.minimumf %3, %2 : vector<10x384xf32>
    %c0_2 = arith.constant 0 : index
    %c0_3 = arith.constant 0 : index
    %5 = vector.load %arg2[%c0_2, %c0_3] : memref<4x384xf32, #tpu.memory_space<vmem>>, vector<4x384xf32>
    %6 = vector.extract_strided_slice %5 {offsets = [0, 0], sizes = [1, 384], strides = [1, 1]} : vector<4x384xf32> to vector<1x384xf32>
    %7 = vector.extract_strided_slice %5 {offsets = [1, 0], sizes = [1, 384], strides = [1, 1]} : vector<4x384xf32> to vector<1x384xf32>
    %8 = vector.extract_strided_slice %5 {offsets = [2, 0], sizes = [1, 384], strides = [1, 1]} : vector<4x384xf32> to vector<1x384xf32>
    %9 = vector.extract_strided_slice %5 {offsets = [3, 0], sizes = [1, 384], strides = [1, 1]} : vector<4x384xf32> to vector<1x384xf32>
    %10 = arith.fptosi %9 : vector<1x384xf32> to vector<1x384xi32>
    %11 = tpu.iota {dimensions = array<i32: 0>} : vector<10x384xi32>
    %12 = vector.broadcast %10 : vector<1x384xi32> to vector<10x384xi32>
    %13 = arith.cmpi eq, %11, %12 : vector<10x384xi32>
    %cst_4 = arith.constant 0.000000e+00 : f32
    %14 = vector.broadcast %cst_4 : f32 to vector<10x384xf32>
    %15 = arith.select %13, %4, %14 : vector<10x384xi1>, vector<10x384xf32>
    %cst_5 = arith.constant dense<0.000000e+00> : vector<384xf32>
    %16 = vector.multi_reduction <add>, %15, %cst_5 [0] : vector<10x384xf32> to vector<384xf32>
    %17 = vector.shape_cast %16 : vector<384xf32> to vector<1x384xf32>
    %18 = arith.mulf %17, %17 : vector<1x384xf32>
    %cst_6 = arith.constant 1.000000e+00 : f32
    %19 = vector.broadcast %cst_6 : f32 to vector<1x384xf32>
    %20 = arith.subf %19, %18 : vector<1x384xf32>
    %cst_7 = arith.constant 0.000000e+00 : f32
    %21 = vector.broadcast %cst_7 : f32 to vector<1x384xf32>
    %22 = arith.maximumf %20, %21 : vector<1x384xf32>
    %23 = math.sqrt %22 : vector<1x384xf32>
    %24 = arith.mulf %17, %6 : vector<1x384xf32>
    %25 = arith.mulf %23, %7 : vector<1x384xf32>
    %26 = arith.subf %24, %25 : vector<1x384xf32>
    %cst_8 = arith.constant 9.99999814E-4 : f32
    %27 = vector.broadcast %cst_8 : f32 to vector<1x384xf32>
    %28 = arith.cmpf olt, %7, %27 : vector<1x384xf32>
    %cst_9 = arith.constant 0.999999523 : f32
    %29 = vector.broadcast %cst_9 : f32 to vector<1x384xf32>
    %30 = arith.mulf %29, %6 : vector<1x384xf32>
    %cst_10 = arith.constant 9.99999814E-4 : f32
    %31 = vector.broadcast %cst_10 : f32 to vector<1x384xf32>
    %32 = arith.mulf %31, %7 : vector<1x384xf32>
    %33 = arith.addf %30, %32 : vector<1x384xf32>
    %cst_11 = arith.constant 2.000000e+00 : f32
    %34 = vector.broadcast %cst_11 : f32 to vector<1x384xf32>
    %35 = arith.select %28, %33, %34 : vector<1x384xi1>, vector<1x384xf32>
    %cst_12 = arith.constant -9.99999814E-4 : f32
    %36 = vector.broadcast %cst_12 : f32 to vector<1x384xf32>
    %37 = arith.cmpf ogt, %7, %36 : vector<1x384xf32>
    %cst_13 = arith.constant 9.99999814E-4 : f32
    %38 = vector.broadcast %cst_13 : f32 to vector<1x384xf32>
    %39 = arith.mulf %38, %7 : vector<1x384xf32>
    %cst_14 = arith.constant 0.999999523 : f32
    %40 = vector.broadcast %cst_14 : f32 to vector<1x384xf32>
    %41 = arith.mulf %40, %6 : vector<1x384xf32>
    %42 = arith.subf %39, %41 : vector<1x384xf32>
    %cst_15 = arith.constant -2.000000e+00 : f32
    %43 = vector.broadcast %cst_15 : f32 to vector<1x384xf32>
    %44 = arith.select %37, %42, %43 : vector<1x384xi1>, vector<1x384xf32>
    %45 = arith.cmpf ogt, %17, %35 : vector<1x384xf32>
    %cst_16 = arith.constant 0.999999523 : f32
    %46 = vector.broadcast %cst_16 : f32 to vector<1x384xf32>
    %47 = arith.select %45, %46, %26 : vector<1x384xi1>, vector<1x384xf32>
    %48 = arith.cmpf olt, %17, %44 : vector<1x384xf32>
    %cst_17 = arith.constant -0.999999523 : f32
    %49 = vector.broadcast %cst_17 : f32 to vector<1x384xf32>
    %50 = arith.select %48, %49, %47 : vector<1x384xi1>, vector<1x384xf32>
    %51 = arith.subf %50, %8 : vector<1x384xf32>
    %cst_18 = arith.constant 1.000000e+01 : f32
    %52 = vector.broadcast %cst_18 : f32 to vector<1x384xf32>
    %53 = arith.mulf %51, %52 : vector<1x384xf32>
    %cst_19 = arith.constant 1.000000e+01 : f32
    %54 = vector.broadcast %cst_19 : f32 to vector<10x384xf32>
    %55 = arith.mulf %4, %54 : vector<10x384xf32>
    %56 = vector.shape_cast %53 : vector<1x384xf32> to vector<1x384xf32>
    %57 = vector.broadcast %56 : vector<1x384xf32> to vector<10x384xf32>
    %58 = arith.select %13, %57, %55 : vector<10x384xi1>, vector<10x384xf32>
    %cst_20 = arith.constant dense<0xFF800000> : vector<384xf32>
    %59 = vector.multi_reduction <maximumf>, %58, %cst_20 [0] : vector<10x384xf32> to vector<384xf32>
    %60 = vector.shape_cast %59 : vector<384xf32> to vector<1x384xf32>
    %61 = vector.broadcast %60 : vector<1x384xf32> to vector<10x384xf32>
    %62 = arith.subf %58, %61 : vector<10x384xf32>
    %63 = math.exp %62 : vector<10x384xf32>
    %cst_21 = arith.constant dense<0.000000e+00> : vector<384xf32>
    %64 = vector.multi_reduction <add>, %63, %cst_21 [0] : vector<10x384xf32> to vector<384xf32>
    %65 = vector.shape_cast %64 : vector<384xf32> to vector<1x384xf32>
    %66 = math.log %65 : vector<1x384xf32>
    %67 = arith.addf %66, %60 : vector<1x384xf32>
    %68 = tpu.iota {dimensions = array<i32: 1>} : vector<1x384xi32>
    %c384_i32 = arith.constant 384 : i32
    %69 = arith.muli %arg0, %c384_i32 : i32
    %70 = vector.broadcast %69 : i32 to vector<1x384xi32>
    %71 = arith.addi %68, %70 : vector<1x384xi32>
    %c300_i32 = arith.constant 300 : i32
    %72 = vector.broadcast %c300_i32 : i32 to vector<1x384xi32>
    %73 = arith.cmpi slt, %71, %72 : vector<1x384xi32>
    %74 = arith.extui %73 : vector<1x384xi1> to vector<1x384xi32>
    %75 = arith.sitofp %74 : vector<1x384xi32> to vector<1x384xf32>
    %76 = arith.subf %67, %53 : vector<1x384xf32>
    %77 = arith.mulf %76, %75 : vector<1x384xf32>
    %78 = vector.shape_cast %77 : vector<1x384xf32> to vector<1x1x384xf32>
    %cst_22 = arith.constant dense<0.000000e+00> : vector<1xf32>
    %79 = vector.multi_reduction <add>, %78, %cst_22 [1, 2] : vector<1x1x384xf32> to vector<1xf32>
    %80 = vector.shape_cast %79 : vector<1xf32> to vector<1x1x1xf32>
    %81 = vector.extract %80[0, 0, 0] : f32 from vector<1x1x1xf32>
    %82 = tpu.iota {dimensions = array<i32: 0>} : vector<8x128xi32>
    %83 = tpu.iota {dimensions = array<i32: 1>} : vector<8x128xi32>
    %c0_i32 = arith.constant 0 : i32
    %84 = vector.broadcast %c0_i32 : i32 to vector<8x128xi32>
    %85 = arith.cmpi eq, %82, %84 : vector<8x128xi32>
    %c0_i32_23 = arith.constant 0 : i32
    %86 = vector.broadcast %c0_i32_23 : i32 to vector<8x128xi32>
    %87 = arith.cmpi eq, %83, %86 : vector<8x128xi32>
    %88 = arith.andi %85, %87 : vector<8x128xi1>
    %cst_24 = arith.constant 0.000000e+00 : f32
    %89 = vector.broadcast %81 : f32 to vector<8x128xf32>
    %90 = vector.broadcast %cst_24 : f32 to vector<8x128xf32>
    %91 = arith.select %88, %89, %90 : vector<8x128xi1>, vector<8x128xf32>
    %c0_25 = arith.constant 0 : index
    %c0_26 = arith.constant 0 : index
    %92 = vector.load %arg3[%c0_25, %c0_26] : memref<8x128xf32, #tpu.memory_space<vmem>>, vector<8x128xf32>
    tpu.vector_store %arg3[%c0_25, %c0_26], %91 {strides = array<i32>} : memref<8x128xf32, #tpu.memory_space<vmem>>, vector<8x128xf32>,
    return
  }
  func.func @transform_0(%arg0: i32) -> (i32, i32) {
    %c0_i32 = arith.constant 0 : i32
    %c0_i32_0 = arith.constant 0 : i32
    return %c0_i32, %arg0 : i32, i32
  }
  func.func @transform_1(%arg0: i32) -> (i32, i32) {
    %c0_i32 = arith.constant 0 : i32
    %c0_i32_0 = arith.constant 0 : i32
    return %c0_i32, %arg0 : i32, i32
  }
  func.func @transform_2(%arg0: i32) -> (i32, i32) {
    %c0_i32 = arith.constant 0 : i32
    %c0_i32_0 = arith.constant 0 : i32
    return %c0_i32, %arg0 : i32, i32
  }
}

</mosaic_0001>

<bundles_post_ra>
// kernel: tpu_custom_call.1
= control target key start
LH: loop header
LB: loop body
LE: loop exit
PB: predicated region body
PF: predicated region fallthrough
CT: control target
= control target key end

     0   :  { %7 = vsyncpa [#allocation3], 0  ;;  %s839_s0 = inlined_call_operand.hbm [shape: f32[10,384], index: 0, kind: input, shape index: {}]   ;;  %s840_s1 = inlined_call_operand.hbm [shape: f32[4,384], index: 1, kind: input, shape index: {}]   ;;  %s841_s2 = inlined_call_operand.hbm [shape: f32[8,128], index: 2, kind: output, shape index: {}]  }
   0x1   :  { %8 = vsyncpa [#allocation6], 0 }
   0x2   :  { %9 = vsyncpa [#allocation4], 0  ;;  %s575_s9 = smov [#allocation2]   ;;  %s503_s13 = scalar_lea.hbm %s839_s0, 768 }
   0x3   :  { %s15_s10 = sshll.u32 %s575_s9, 4  ;;  %p504_p0 = scmp.ne.s32.totalorder %s839_s0, %s503_s13  ;;  %s16_s10 = int_to_ptr.vmem [resolvable:$true] %s15_s10 }
   0x4   :  { %p507_p1 = scmp.lt.u32.totalorder %s503_s13, %s839_s0 }
   0x6   :  { %p509_p2 = pnand %p507_p1, %p504_p0 }
   0x8   :  { %512 = shalt.err (!%p509_p2)
}
   0x9   :  { %s513_s18 = scalar_lea.vmem %s16_s10, 768  ;;  %p518_p4 = scmp.lt.s32.totalorder %s16_s10, %s16_s10 }
   0xa   :  { %p514_p3 = scmp.ne.s32.totalorder %s16_s10, %s513_s18  ;;  %p519_p5 = scmp.lt.s32.totalorder %s513_s18, %s513_s18 }
   0xc   :  { %p520_p6 = por %p519_p5, %p518_p4 }
   0xe   :  { %p521_p7 = pnand %p520_p6, %p514_p3 }
  0x10   :  { %524 = shalt.err (!%p521_p7)
}
  0x11   :  { %s576_s19 = smov 384   ;;  %s577_s20 = smov 24  }
  0x12   :  { %21 = dma.hbm_to_vmem [thread:$0]  %s839_s0, 768, %s16_s10, [#allocation3], %s576_s19, %s576_s19, %s577_s20  }
  0x13   :  { %s578_s23 = smov [#allocation5]   ;;  %s525_s27 = scalar_lea.hbm %s840_s1, 192 }
  0x14   :  { %s28_s24 = sshll.u32 %s578_s23, 4  ;;  %p526_p8 = scmp.ne.s32.totalorder %s840_s1, %s525_s27  ;;  %s29_s24 = int_to_ptr.vmem [resolvable:$true] %s28_s24 }
  0x15   :  { %p529_p9 = scmp.lt.u32.totalorder %s525_s27, %s840_s1 }
  0x17   :  { %p531_p10 = pnand %p529_p9, %p526_p8 }
  0x19   :  { %534 = shalt.err (!%p531_p10)
}
  0x1a   :  { %s535_s4 = scalar_lea.vmem %s29_s24, 192  ;;  %p540_p12 = scmp.lt.s32.totalorder %s29_s24, %s29_s24 }
  0x1b   :  { %p536_p11 = scmp.ne.s32.totalorder %s29_s24, %s535_s4  ;;  %p541_p13 = scmp.lt.s32.totalorder %s535_s4, %s535_s4 }
  0x1d   :  { %p542_p0 = por %p541_p13, %p540_p12 }
  0x1f   :  { %p543_p1 = pnand %p542_p0, %p536_p11 }
  0x21   :  { %546 = shalt.err (!%p543_p1)
}
  0x22   :  { %31 = dma.hbm_to_vmem [thread:$0]  %s840_s1, 192, %s29_s24, [#allocation6]  }
  0x23   :  { %569 = dma.done.wait [#allocation3], 768  }
  0x24   :  { %570 = vsyncadd [#allocation3], 4294966528 }
  0x25   :  { %571 = dma.done.wait [#allocation6], 192  }
  0x26   :  { %572 = vsyncadd [#allocation6], 4294967104  ;;  %v60_v0 = vlaneseq  ;;  %v623_v2 = vld [vmem:[#allocation5] sm:$0xff]  ;;  %v625_v3 = vld [vmem:[#allocation5 + $0x8] sm:$0xf]  ;;  %vm99_vm0 = vcmask 1041408  }
  0x27   :  { %v627_v4 = vld [vmem:[#allocation2] sm:$0xff]  ;;  %v467_v5 = vtrunc.f32 %v623_v2  ;;  %v469_v6 = vtrunc.f32 %v625_v3  ;;  %v633_v9 = vld [vmem:[#allocation2 + $0x8] sm:$0xff]  ;;  %v635_v10 = vld [vmem:[#allocation2 + $0x10] sm:$0xff]  ;;  %v199_v53 = vmul.f32 0.0009999998, %v623_v2  ;;  %s580_s1 = smov [#allocation7]  }
  0x28   :  { %v621_v1 = vshrl.u32 %v60_v0, 7  ;;  %v637_v11 = vld [vmem:[#allocation2 + $0x18] sm:$0x3]  ;;  %v639_v12 = vld [vmem:[#allocation2 + $0x20] sm:$0x3]  ;;  %s448_s6 = sshll.u32 %s580_s1, 4  ;;  %s449_s6 = int_to_ptr.vmem [resolvable:$true] %s448_s6 }
  0x29   :  { %v468_v13 = vcvt.f32.s32 %v467_v5  ;;  %v470_v14 = vcvt.f32.s32 %v469_v6  ;;  %v641_v15 = vld [vmem:[#allocation2 + $0x28] sm:$0x3]  ;;  %v458_v16 = vclamps-f32 %v627_v4, 0.999  ;;  %v459_v18 = vclamps-f32 %v633_v9, 0.999  ;;  %p552_p3 = scmp.lt.s32.totalorder %s449_s6, %s449_s6 }
  0x2a   :  { %v65_v7 = vsub.s32 3, %v621_v1  ;;  %v69_v8 = vsub.s32 7, %v621_v1  ;;  %v645_v17 = vadd.s32 8, %v621_v1  ;;  %v460_v22 = vclamps-f32 %v635_v10, 0.999  ;;  %s547_s8 = scalar_lea.vmem %s449_s6, 128 }
  0x2b   :  { %v461_v23 = vclamps-f32 %v637_v11, 0.999  ;;  %v462_v24 = vclamps-f32 %v639_v12, 0.999  ;;  %v463_v25 = vclamps-f32 %v641_v15, 0.999  ;;  %p548_p2 = scmp.ne.s32.totalorder %s449_s6, %s547_s8  ;;  %p553_p4 = scmp.lt.s32.totalorder %s547_s8, %s547_s8 }
  0x2c   :  { %v66_v19 = vrot.slane %v468_v13, %v65_v7  ;;  %v70_v20 = vrot.slane %v468_v13, %v69_v8  ;;  %v74_v21 = vrot.slane %v470_v14, %v65_v7  ;;  %v200_v57 = vmul.f32 0.0009999998, %v625_v3 }
  0x2d   :  { %v197_v61 = vmul.f32 0.9999995, %v623_v2  ;;  %v198_v62 = vmul.f32 0.9999995, %v625_v3  ;;  %v464_v63 = vrot.slane %v199_v53, 9  ;;  %v303_v4 = vmul.f32 10.0, %v463_v25  ;;  %p554_p5 = por %p553_p4, %p552_p3 }
  0x2e   :  { %v652_v26 = vrot.slane %v66_v19, %v65_v7  ;;  %v654_v27 = vrot.slane %v70_v20, %v65_v7  ;;  %v656_v28 = vrot.slane %v74_v21, %v65_v7  ;;  %v465_v8 = vrot.slane %v200_v57, 9 }
  0x2f   :  { %v209_v20 = vadd.f32 %v464_v63, %v197_v61  ;;  %vm195_vm7 = vcmp.lt.f32.partialorder %v623_v2, 0.0009999998  ;;  %vm196_vm8 = vcmp.lt.f32.partialorder %v625_v3, 0.0009999998  ;;  %vm219_vm9 = vcmp.gt.f32.partialorder %v623_v2, -0.0009999998  ;;  %p555_p6 = pnand %p554_p5, %p548_p2 }
  0x30   :  { %vm87_vm1 = vcmp.eq.s32.totalorder %v621_v1, %v652_v26  ;;  %vm88_vm2 = vcmp.eq.s32.totalorder %v621_v1, %v654_v27  ;;  %vm89_vm3 = vcmp.eq.s32.totalorder %v621_v1, %v656_v28  ;;  %vm90_vm4 = vcmp.eq.s32.totalorder %v645_v17, %v652_v26 }
  0x31   :  { %vm91_vm5 = vcmp.eq.s32.totalorder %v645_v17, %v654_v27  ;;  %vm92_vm6 = vcmp.eq.s32.totalorder %v645_v17, %v656_v28  ;;  %v93_v29 = vsel %vm87_vm1, %v458_v16, 0.0  ;;  %v94_v30 = vsel %vm88_vm2, %v459_v18, 0.0 }
  0x32   :  { %v95_v31 = vsel %vm89_vm3, %v460_v22, 0.0  ;;  %v96_v32 = vsel %vm90_vm4, %v461_v23, 0.0  ;;  %v97_v33 = vsel %vm91_vm5, %v462_v24, 0.0  ;;  %v98_v34 = vsel %vm92_vm6, %v463_v25, 0.0 }
  0x33   :  { %v100_v35 = vsel %vm99_vm0, %v96_v32, 0.0  ;;  %v108_v36 = vsel %vm99_vm0, %v97_v33, 0.0  ;;  %v116_v37 = vsel %vm99_vm0, %v98_v34, 0.0  ;;  %v223_v32 = vrot.slane %v197_v61, 7 }
  0x34   :  { %v101_v38 = vadd.f32 %v100_v35, %v93_v29  ;;  %v109_v39 = vadd.f32 %v108_v36, %v94_v30  ;;  %v117_v40 = vadd.f32 %v116_v37, %v95_v31  ;;  %v210_v31 = vadd.f32 %v465_v8, %v198_v62 }
  0x35   :  { %v224_v33 = vrot.slane %v198_v62, 7  ;;  %v723_v34 = vsub.s32 0, %v621_v1  ;;  %v213_v35 = vrot.slane %v209_v20, 7  ;;  %v162_v37 = vsub.s32 4, %v621_v1 }
  0x36   :  { %v102_v41 = vrot.slane %v101_v38, 4  ;;  %v110_v42 = vrot.slane %v109_v39, 4  ;;  %v118_v43 = vrot.slane %v117_v40, 4  ;;  %v214_v36 = vrot.slane %v210_v31, 7 }
  0x37   :  { %vm220_vm10 = vcmp.gt.f32.partialorder %v625_v3, -0.0009999998 }
  0x38   :  { %v103_v44 = vadd.f32 %v102_v41, %v101_v38  ;;  %v111_v45 = vadd.f32 %v110_v42, %v109_v39  ;;  %v119_v46 = vadd.f32 %v118_v43, %v117_v40  ;;  %v227_v38 = vsub.f32 %v199_v53, %v223_v32 }
  0x39   :  { %v176_v39 = vsub.s32 1, %v621_v1  ;;  %v180_v40 = vsub.s32 5, %v621_v1  ;;  %v228_v41 = vsub.f32 %v200_v57, %v224_v33  ;;  %v217_v42 = vsel %vm195_vm7, %v213_v35, 2.0 }
  0x3a   :  { %v104_v47 = vrot.slane %v103_v44, 2  ;;  %v112_v48 = vrot.slane %v111_v45, 2  ;;  %v120_v49 = vrot.slane %v119_v46, 2  ;;  %v218_v43 = vsel %vm196_vm8, %v214_v36, 2.0 }
  0x3b   :  { %v230_v53 = vsel %vm220_vm10, %v228_v41, -2.0 }
  0x3c   :  { %v105_v50 = vadd.f32 %v104_v47, %v103_v44  ;;  %v113_v51 = vadd.f32 %v112_v48, %v111_v45  ;;  %v121_v52 = vadd.f32 %v120_v49, %v119_v46  ;;  %v279_v44 = vsub.s32 2, %v621_v1 }
  0x3d   :  { %v159_v45 = vrot.slane %v623_v2, %v723_v34  ;;  %v163_v46 = vrot.slane %v623_v2, %v162_v37  ;;  %v229_v47 = vsel %vm219_vm9, %v227_v38, -2.0  ;;  %v283_v48 = vsub.s32 6, %v621_v1 }
  0x3e   :  { %v106_v54 = vrot.slane %v105_v50, 1  ;;  %v114_v55 = vrot.slane %v113_v51, 1  ;;  %v122_v56 = vrot.slane %v121_v52, 1  ;;  %v167_v49 = vrot.slane %v625_v3, %v723_v34 }
  0x3f   :  { %v259_v62 = vrot.slane %v229_v47, %v176_v39  ;;  %v263_v63 = vrot.slane %v229_v47, %v180_v40  ;;  %v267_v36 = vrot.slane %v230_v53, %v176_v39 }
  0x40   :  { %v705_v58 = vadd.f32 %v106_v54, %v105_v50  ;;  %v707_v59 = vadd.f32 %v114_v55, %v113_v51  ;;  %v709_v60 = vadd.f32 %v122_v56, %v121_v52  ;;  %v177_v50 = vrot.slane %v623_v2, %v176_v39 }
  0x41   :  { %v181_v51 = vrot.slane %v623_v2, %v180_v40  ;;  %v185_v52 = vrot.slane %v625_v3, %v176_v39  ;;  %v236_v54 = vrot.slane %v217_v42, %v176_v39  ;;  %v240_v55 = vrot.slane %v217_v42, %v180_v40 }
  0x42   :  { %v124_v5 = vmul.f32 %v705_v58, %v705_v58  ;;  %v125_v6 = vmul.f32 %v707_v59, %v707_v59  ;;  %v126_v7 = vmul.f32 %v709_v60, %v709_v60  ;;  %v244_v56 = vrot.slane %v218_v43, %v176_v39 }
  0x43   :  { %v171_v31 = vmul.f32 %v159_v45, %v705_v58  ;;  %v172_v35 = vmul.f32 %v163_v46, %v707_v59  ;;  %v173_v40 = vmul.f32 %v167_v49, %v709_v60  ;;  %vm248_vm8 = vcmp.gt.f32.partialorder %v705_v58, %v236_v54 }
  0x44   :  { %v127_v13 = vsub.f32 1.0, %v124_v5  ;;  %v128_v14 = vsub.f32 1.0, %v125_v6  ;;  %v129_v19 = vsub.f32 1.0, %v126_v7  ;;  %vm249_vm9 = vcmp.gt.f32.partialorder %v707_v59, %v240_v55 }
  0x45   :  { %vm271_vm10 = vcmp.lt.f32.partialorder %v705_v58, %v259_v62  ;;  %v288_v46 = vrot.slane %v625_v3, %v279_v44  ;;  %v299_v3 = vmul.f32 10.0, %v459_v18 }
  0x46   :  { %v130_v21 = vmax.f32 %v127_v13, 0.0  ;;  %v131_v29 = vmax.f32 %v128_v14, 0.0  ;;  %v719_v30 = vmax.f32 %v129_v19, 0.0 }
  0x48   :  { %479 = vrsqrt.f32 %v130_v21  ;;  %vm135_vm11 = vcmp.eq.f32.partialorder %v130_v21, inf  ;;  %v138_v61 = vand.u32 2147483648, %v130_v21  ;;  %vm137_vm12 = vcmp.eq.f32.partialorder %v130_v21, 0.0 }
  0x49   :  { %481 = vrsqrt.f32 %v131_v29  ;;  %vm142_vm13 = vcmp.eq.f32.partialorder %v131_v29, inf  ;;  %v145_v7 = vand.u32 2147483648, %v131_v29  ;;  %vm144_vm14 = vcmp.eq.f32.partialorder %v131_v29, 0.0 }
  0x4a   :  { %483 = vrsqrt.f32 %v719_v30  ;;  %vm149_vm15 = vcmp.eq.f32.partialorder %v719_v30, inf  ;;  %v152_v14 = vand.u32 2147483648, %v719_v30  ;;  %vm151_vm7 = vcmp.eq.f32.partialorder %v719_v30, 0.0 }
  0x52   :  { %v480_v57 = vpop.eup %479 }
  0x53   :  { %v482_v5 = vpop.eup %481  ;;  %v134_v6 = vmul.f32 %v480_v57, %v130_v21 }
  0x54   :  { %v484_v8 = vpop.eup %483  ;;  %v141_v13 = vmul.f32 %v482_v5, %v131_v29 }
  0x55   :  { %v136_v19 = vsel %vm135_vm11, %v130_v21, %v134_v6  ;;  %v148_v20 = vmul.f32 %v484_v8, %v719_v30  ;;  %v280_v21 = vrot.slane %v623_v2, %v279_v44  ;;  %vm250_vm11 = vcmp.gt.f32.partialorder %v709_v60, %v244_v56 }
  0x56   :  { %v139_v32 = vsel %vm137_vm12, %v138_v61, %v136_v19  ;;  %v143_v33 = vsel %vm142_vm13, %v131_v29, %v141_v13  ;;  %vm272_vm12 = vcmp.lt.f32.partialorder %v707_v59, %v263_v63  ;;  %vm273_vm13 = vcmp.lt.f32.partialorder %v709_v60, %v267_v36 }
  0x57   :  { %v146_v37 = vsel %vm144_vm14, %v145_v7, %v143_v33  ;;  %v150_v38 = vsel %vm149_vm15, %v719_v30, %v148_v20  ;;  %v189_v41 = vmul.f32 %v177_v50, %v139_v32  ;;  %v284_v30 = vrot.slane %v623_v2, %v283_v48 }
  0x58   :  { %v153_v42 = vsel %vm151_vm7, %v152_v14, %v150_v38  ;;  %v190_v43 = vmul.f32 %v181_v51, %v146_v37  ;;  %v298_v59 = vmul.f32 10.0, %v458_v16  ;;  %v301_v2 = vmul.f32 10.0, %v461_v23 }
  0x59   :  { %v191_v47 = vmul.f32 %v185_v52, %v153_v42  ;;  %v192_v57 = vsub.f32 %v171_v31, %v189_v41  ;;  %v302_v60 = vmul.f32 10.0, %v462_v24  ;;  %v300_v56 = vmul.f32 10.0, %v460_v22 }
  0x5a   :  { %v193_v29 = vsub.f32 %v172_v35, %v190_v43 }
  0x5b   :  { %v194_v39 = vsub.f32 %v173_v40, %v191_v47  ;;  %v251_v45 = vsel %vm248_vm8, 0.9999995, %v192_v57 }
  0x5c   :  { %v252_v49 = vsel %vm249_vm9, 0.9999995, %v193_v29  ;;  %v274_v50 = vsel %vm271_vm10, -0.9999995, %v251_v45 }
  0x5d   :  { %v253_v51 = vsel %vm250_vm11, 0.9999995, %v194_v39  ;;  %v275_v52 = vsel %vm272_vm12, -0.9999995, %v252_v49  ;;  %v292_v53 = vsub.f32 %v274_v50, %v280_v21 }
  0x5e   :  { %v276_v54 = vsel %vm273_vm13, -0.9999995, %v253_v51  ;;  %v293_v58 = vsub.f32 %v275_v52, %v284_v30 }
  0x5f   :  { %v294_v55 = vsub.f32 %v276_v54, %v288_v46  ;;  %v759_v61 = vmul.f32 10.0, %v292_v53 }
  0x60   :  { %v765_v48 = vmul.f32 10.0, %v293_v58 }
  0x61   :  { %v771_v44 = vmul.f32 10.0, %v294_v55  ;;  %v307_v11 = vrot.slane %v759_v61, %v723_v34 }
  0x62   :  { %v311_v16 = vrot.slane %v765_v48, %v723_v34 }
  0x63   :  { %v315_v9 = vrot.slane %v771_v44, %v723_v34  ;;  %v316_v12 = vsel %vm87_vm1, %v307_v11, %v298_v59  ;;  %v319_v10 = vsel %vm90_vm4, %v307_v11, %v301_v2  ;;  %vm421_vm1 = vcmask 1040384  }
  0x64   :  { %v317_v15 = vsel %vm88_vm2, %v311_v16, %v299_v3  ;;  %v320_v18 = vsel %vm91_vm5, %v311_v16, %v302_v60  ;;  %v322_v22 = vsel %vm99_vm0, %v319_v10, -inf  ;;  %vm436_vm2 = vcmp.eq.s32.totalorder %v621_v1, 0 }
  0x65   :  { %v318_v23 = vsel %vm89_vm3, %v315_v9, %v300_v56  ;;  %v321_v24 = vsel %vm92_vm6, %v315_v9, %v303_v4  ;;  %v323_v25 = vmax.f32 %v316_v12, %v322_v22  ;;  %v330_v26 = vsel %vm99_vm0, %v320_v18, -inf }
  0x66   :  { %v331_v34 = vmax.f32 %v317_v15, %v330_v26  ;;  %v338_v62 = vsel %vm99_vm0, %v321_v24, -inf }
  0x67   :  { %v324_v63 = vrot.slane %v323_v25, 4  ;;  %v339_v5 = vmax.f32 %v318_v23, %v338_v62 }
  0x68   :  { %v332_v27 = vrot.slane %v331_v34, 4 }
  0x69   :  { %v325_v6 = vmax.f32 %v323_v25, %v324_v63  ;;  %v340_v7 = vrot.slane %v339_v5, 4 }
  0x6a   :  { %v333_v8 = vmax.f32 %v331_v34, %v332_v27  ;;  %v398_v27 = vand.u32 127, %v60_v0 }
  0x6b   :  { %v326_v13 = vrot.slane %v325_v6, 2  ;;  %v341_v14 = vmax.f32 %v339_v5, %v340_v7 }
  0x6c   :  { %v334_v19 = vrot.slane %v333_v8, 2  ;;  %vm437_vm3 = vcmp.eq.s32.totalorder %v398_v27, 0 }
  0x6d   :  { %v327_v20 = vmax.f32 %v325_v6, %v326_v13  ;;  %v342_v31 = vrot.slane %v341_v14, 2  ;;  %v400_v6 = vadd.s32 256, %v398_v27  ;;  %vm438_vm4 = vmand %vm436_vm2, %vm437_vm3 }
  0x6e   :  { %v335_v32 = vmax.f32 %v333_v8, %v334_v19 }
  0x6f   :  { %v328_v17 = vrot.slane %v327_v20, 1  ;;  %v343_v28 = vmax.f32 %v341_v14, %v342_v31 }
  0x70   :  { %v336_v33 = vrot.slane %v335_v32, 1 }
  0x71   :  { %v804_v35 = vmax.f32 %v327_v20, %v328_v17  ;;  %v344_v36 = vrot.slane %v343_v28, 1 }
  0x72   :  { %v806_v37 = vmax.f32 %v335_v32, %v336_v33  ;;  %v579_v33 = vmov 0.0  }
  0x73   :  { %v808_v38 = vmax.f32 %v343_v28, %v344_v36  ;;  %v346_v40 = vsub.f32 %v316_v12, %v804_v35  ;;  %v349_v41 = vsub.f32 %v319_v10, %v804_v35 }
  0x74   :  { %v347_v42 = vsub.f32 %v317_v15, %v806_v37  ;;  %v350_v43 = vsub.f32 %v320_v18, %v806_v37 }
  0x75   :  { %v348_v21 = vsub.f32 %v318_v23, %v808_v38  ;;  %v351_v47 = vsub.f32 %v321_v24, %v808_v38  ;;  %v352_v57 = vmul.f32 1.442695, %v346_v40  ;;  %v358_v30 = vmul.f32 1.442695, %v349_v41 }
  0x76   :  { %v354_v29 = vmul.f32 1.442695, %v347_v42  ;;  %v360_v45 = vmul.f32 1.442695, %v350_v43 }
  0x77   :  { %485 = vpow2.f32 %v352_v57  ;;  %v356_v39 = vmul.f32 1.442695, %v348_v21  ;;  %v362_v46 = vmul.f32 1.442695, %v351_v47 }
  0x78   :  { %487 = vpow2.f32 %v354_v29 }
  0x79   :  { %489 = vpow2.f32 %v356_v39 }
  0x7a   :  { %491 = vpow2.f32 %v358_v30 }
  0x7b   :  { %493 = vpow2.f32 %v360_v45 }
  0x7c   :  { %495 = vpow2.f32 %v362_v46 }
  0x81   :  { %v486_v49 = vpop.eup %485 }
  0x82   :  { %v488_v50 = vpop.eup %487 }
  0x83   :  { %v490_v51 = vpop.eup %489 }
  0x84   :  { %v492_v52 = vpop.eup %491 }
  0x85   :  { %v494_v53 = vpop.eup %493  ;;  %v364_v54 = vsel %vm99_vm0, %v492_v52, 0.0 }
  0x86   :  { %v496_v58 = vpop.eup %495  ;;  %v365_v55 = vadd.f32 %v486_v49, %v364_v54  ;;  %v372_v59 = vsel %vm99_vm0, %v494_v53, 0.0 }
  0x87   :  { %v373_v2 = vadd.f32 %v488_v50, %v372_v59  ;;  %v380_v3 = vsel %vm99_vm0, %v496_v58, 0.0  ;;  %vm408_vm0 = vcmp.lt.s32.totalorder %v400_v6, 300 }
  0x88   :  { %v366_v60 = vrot.slane %v365_v55, 4  ;;  %v381_v56 = vadd.f32 %v490_v51, %v380_v3  ;;  %v466_v36 = vsel %vm408_vm0, 1.0, %v579_v33 }
  0x89   :  { %v374_v4 = vrot.slane %v373_v2, 4 }
  0x8a   :  { %v367_v11 = vadd.f32 %v366_v60, %v365_v55  ;;  %v382_v16 = vrot.slane %v381_v56, 4 }
  0x8b   :  { %v375_v9 = vadd.f32 %v374_v4, %v373_v2 }
  0x8c   :  { %v368_v12 = vrot.slane %v367_v11, 2  ;;  %v383_v10 = vadd.f32 %v382_v16, %v381_v56 }
  0x8d   :  { %v376_v15 = vrot.slane %v375_v9, 2 }
  0x8e   :  { %v369_v18 = vadd.f32 %v368_v12, %v367_v11  ;;  %v384_v22 = vrot.slane %v383_v10, 2 }
  0x8f   :  { %v377_v23 = vadd.f32 %v376_v15, %v375_v9 }
  0x90   :  { %v370_v24 = vrot.slane %v369_v18, 1  ;;  %v385_v25 = vadd.f32 %v384_v22, %v383_v10 }
  0x91   :  { %v378_v26 = vrot.slane %v377_v23, 1 }
  0x92   :  { %v371_v34 = vadd.f32 %v370_v24, %v369_v18  ;;  %v386_v62 = vrot.slane %v385_v25, 1 }
  0x93   :  { %v379_v63 = vadd.f32 %v378_v26, %v377_v23 }
  0x94   :  { %v387_v5 = vadd.f32 %v386_v62, %v385_v25  ;;  %497 = vlog2.f32 %v371_v34 }
  0x95   :  { %499 = vlog2.f32 %v379_v63 }
  0x96   :  { %501 = vlog2.f32 %v387_v5 }
  0x9e   :  { %v498_v7 = vpop.eup %497 }
  0x9f   :  { %v500_v8 = vpop.eup %499  ;;  %v389_v13 = vmul.f32 0.6931472, %v498_v7 }
  0xa0   :  { %v502_v14 = vpop.eup %501  ;;  %v391_v19 = vmul.f32 0.6931472, %v500_v8 }
  0xa1   :  { %v393_v20 = vmul.f32 0.6931472, %v502_v14  ;;  %v394_v31 = vadd.f32 %v389_v13, %v804_v35 }
  0xa2   :  { %v395_v32 = vadd.f32 %v391_v19, %v806_v37 }
  0xa3   :  { %v396_v17 = vadd.f32 %v393_v20, %v808_v38  ;;  %v415_v28 = vsub.f32 %v394_v31, %v759_v61 }
  0xa4   :  { %v416_v0 = vsub.f32 %v395_v32, %v765_v48 }
  0xa5   :  { %v417_v40 = vsub.f32 %v396_v17, %v771_v44  ;;  %v422_v41 = vsel %vm421_vm1, %v415_v28, 0.0 }
  0xa6   :  { %v423_v42 = vsel %vm421_vm1, %v416_v0, 0.0 }
  0xa7   :  { %v420_v43 = vmul.f32 %v466_v36, %v417_v40  ;;  %v424_v21 = vadd.f32 %v423_v42, %v422_v41 }
  0xa9   :  { %v425_v47 = vsel %vm421_vm1, %v420_v43, 0.0 }
  0xaa   :  { %v426_v35 = vadd.f32 %v425_v47, %v424_v21 }
  0xac   :  { %427 = vadd.xlane.f32.xlu0 %v426_v35 }
 0x139   :  { %v428_v57 = vpop.xlane.xlu0 %427 }
 0x13a   :  { %v429_v37 = vrot.slane %v428_v57, 4 }
 0x13c   :  { %v430_v29 = vadd.f32 %v429_v37, %v428_v57 }
 0x13e   :  { %v431_v30 = vrot.slane %v430_v29, 2 }
 0x140   :  { %v432_v38 = vadd.f32 %v431_v30, %v430_v29 }
 0x142   :  { %v433_v39 = vrot.slane %v432_v38, 1 }
 0x144   :  { %v434_v61 = vadd.f32 %v433_v39, %v432_v38 }
 0x146   :  { %471 = vpush %v434_v61 }
 0x177   :  { %s472_s7 = spop %471 }
 0x178   :  { %v439_v48 = vstv %s472_s7 }
 0x179   :  { %v440_v44 = vsel %vm438_vm4, %v439_v48, 0.0 }
 0x17a   :  { %441 = vst [vmem:[#allocation7] sm:$0xff] %v440_v44 }
 0x17b   :  { %558 = shalt.err (!%p555_p6)
}
 0x17c   :  { %s559_s11 = scalar_lea.hbm %s841_s2, 128 }
 0x17d   :  { %p560_p7 = scmp.ne.s32.totalorder %s841_s2, %s559_s11  ;;  %p563_p8 = scmp.lt.u32.totalorder %s559_s11, %s841_s2 }
 0x17f   :  { %p565_p9 = pnand %p563_p8, %p560_p7 }
 0x181   :  { %568 = shalt.err (!%p565_p9)
}
 0x182   :  { %451 = dma.vmem_to_hbm [thread:$0]  %s449_s6, 128, %s841_s2, [#allocation4]  }
 0x183   :  { %573 = dma.done.wait [#allocation4], 128  }
 0x184   :  { %574 = vsyncadd [#allocation4], 4294967168 }
 0x185   :  { %455 = vsyncpa [#allocation3], 1 }
 0x186   :  { %456 = vsyncpa [#allocation6], 1 }
 0x187   :  { %457 = vsyncpa [#allocation4], 1 }

</bundles_post_ra>
